<compile_context>
chip_gen: v7x
topology: tpu7x:2x2x1
jax: 0.10.0
libtpu: 0.0.40
codegen_flags: <defaults>
</compile_context>

<pallas_src>
import math
import jax
import jax.numpy as jnp
from jax.experimental import pallas as pl
from jax.experimental.pallas import tpu as pltpu

K = 4            # DCGAN transposed-conv kernel size
BN_EPS = 1e-5    # nn.BatchNorm2d default eps
LANE = 128       # TPU lane width
VMEM_LIMIT = 48 * 1024 * 1024   # > v5e/v6e scoped defaults, < v7x 64 MiB physical


def _round_up(x, m):
    return (x + m - 1) // m * m


def _pick_row_tile(rows, kin_p, cout_p):
    """Largest row tile (<=512) that divides the padded row count and keeps the
    double-buffered VMEM working set (x tile + weight block + y tile) within
    ~28 MiB (14 MiB per copy)."""
    w_bytes = kin_p * cout_p * 2            # bf16 weight block
    per_row = (kin_p + cout_p) * 2          # bf16 tap row + bf16 y row
    budget = 14 * 1024 * 1024
    tr = 512
    while tr > 16 and (w_bytes + tr * per_row > budget or rows % tr != 0):
        tr //= 2
    if rows % tr != 0:                      # tiny row counts (noise2feat): pad up
        tr = min(tr, _round_up(rows, 16))
    return tr


# ---------------------------------------------------------------------------
# Pallas kernels
# ---------------------------------------------------------------------------
def _matmul_stats_kernel(x_ref, w_ref, y_ref, s_ref):
    """(row_tile x kin) @ (kin x cout) on the MXU.  The raw conv output is
    stored in bf16; per-tile BN partial sums / sums-of-squares are computed
    from the f32 accumulator and stored with two sublane-sliced stores
    (rows 2..7 of the stats block are never written nor read)."""
    acc = jnp.dot(x_ref[0], w_ref[0], preferred_element_type=jnp.float32)
    y_ref[0] = acc.astype(y_ref.dtype)
    s_ref[0, 0, 0:1, :] = jnp.sum(acc, axis=0, keepdims=True)
    s_ref[0, 0, 1:2, :] = jnp.sum(acc * acc, axis=0, keepdims=True)


def _matmul_bias_tanh_kernel(x_ref, w_ref, b_ref, o_ref):
    """Output layer: matmul + conv bias + tanh, stored in bf16."""
    acc = jnp.dot(x_ref[0], w_ref[0], preferred_element_type=jnp.float32)
    o_ref[0] = jnp.tanh(acc + b_ref[...]).astype(o_ref.dtype)


# ---------------------------------------------------------------------------
# pallas_call wrappers
# ---------------------------------------------------------------------------
def _conv_phases_bn_stats(taps, weights, tr):
    """taps: (Pt, rows_p, kin_p) bf16, Pt in {1, P}; weights: (P, kin_p, cout_p)
    bf16.  Returns raw conv output (P, rows_p, cout_p) bf16 and BN partial
    stats (P, ntiles, 8, cout_p) f32 (row 0 = sum, row 1 = sum of squares)."""
    n_phase, kin_p, cout_p = weights.shape
    pt, rows_p, _ = taps.shape
    ntiles = rows_p // tr
    x_idx = (lambda p, r: (0, r, 0)) if pt == 1 else (lambda p, r: (p, r, 0))
    flops = 2 * n_phase * rows_p * kin_p * cout_p
    bytes_acc = (rows_p * kin_p * 2 * (1 if pt == 1 else n_phase)
                 + n_phase * kin_p * cout_p * 2
                 + n_phase * rows_p * cout_p * 2
                 + n_phase * ntiles * 8 * cout_p * 4)
    return pl.pallas_call(
        _matmul_stats_kernel,
        out_shape=(jax.ShapeDtypeStruct((n_phase, rows_p, cout_p), jnp.bfloat16),
                   jax.ShapeDtypeStruct((n_phase, ntiles, 8, cout_p), jnp.float32)),
        grid_spec=pltpu.PrefetchScalarGridSpec(
            num_scalar_prefetch=0,
            # phase OUTER: the per-phase weight block index is constant along
            # the inner row axis, so it is fetched once per phase.  Both axes
            # are independent ("parallel"); phase extent 4/16 splits evenly
            # across v7x's two TensorCores.
            grid=(n_phase, ntiles),
            in_specs=[pl.BlockSpec((1, tr, kin_p), x_idx),
                      pl.BlockSpec((1, kin_p, cout_p), lambda p, r: (p, 0, 0))],
            out_specs=[pl.BlockSpec((1, tr, cout_p), lambda p, r: (p, r, 0)),
                       pl.BlockSpec((1, 1, 8, cout_p), lambda p, r: (p, r, 0, 0))]),
        compiler_params=pltpu.CompilerParams(
            dimension_semantics=("parallel", "parallel"),
            vmem_limit_bytes=VMEM_LIMIT),
        cost_estimate=pl.CostEstimate(flops=flops, transcendentals=0,
                                      bytes_accessed=bytes_acc),
    )(taps, weights)


def _conv_phases_tanh(taps, weights, bias, tr):
    """Output layer: conv phases + bias + tanh, bf16 result (P, rows_p, cout_p)."""
    n_phase, kin_p, cout_p = weights.shape
    pt, rows_p, _ = taps.shape
    ntiles = rows_p // tr
    x_idx = (lambda p, r: (0, r, 0)) if pt == 1 else (lambda p, r: (p, r, 0))
    flops = 2 * n_phase * rows_p * kin_p * cout_p
    return pl.pallas_call(
        _matmul_bias_tanh_kernel,
        out_shape=jax.ShapeDtypeStruct((n_phase, rows_p, cout_p), jnp.bfloat16),
        grid_spec=pltpu.PrefetchScalarGridSpec(
            num_scalar_prefetch=0,
            grid=(n_phase, ntiles),
            in_specs=[pl.BlockSpec((1, tr, kin_p), x_idx),
                      pl.BlockSpec((1, kin_p, cout_p), lambda p, r: (p, 0, 0)),
                      pl.BlockSpec((1, cout_p), lambda p, r: (0, 0))],
            out_specs=pl.BlockSpec((1, tr, cout_p), lambda p, r: (p, r, 0))),
        compiler_params=pltpu.CompilerParams(
            dimension_semantics=("parallel", "parallel"),
            vmem_limit_bytes=VMEM_LIMIT),
        cost_estimate=pl.CostEstimate(
            flops=flops, transcendentals=n_phase * rows_p * cout_p,
            bytes_accessed=n_phase * rows_p * (kin_p + cout_p) * 2),
    )(taps, weights, bias)


# ---------------------------------------------------------------------------
# One-time weight packing (hoisted out of the forward pass)
# ---------------------------------------------------------------------------
# Sub-pixel decomposition for ConvT(k=4, s=2, p=1): kernel index per
# (output parity pi/pj, tap d in {0,1}).
_KIDX = ((3, 1), (2, 0))


def _pack_convt_s2_weight(w_pt, cout_p):
    """PyTorch ConvT weight (Cin, Cout, 4, 4) -> (4, kin_p, cout_p) bf16 per-phase
    weights; kin-axis tap order matches the concat order in _s2_taps."""
    cin, cout = w_pt.shape[0], w_pt.shape[1]
    kin = 4 * cin
    kin_p = _round_up(kin, LANE)
    phases = []
    for pi in (0, 1):
        for pj in (0, 1):
            blocks = [w_pt[:, :, _KIDX[pi][dh], _KIDX[pj][dw]]
                      for dh in (0, 1) for dw in (0, 1)]
            phases.append(jnp.concatenate(blocks, axis=0))        # (4*cin, cout)
    w = jnp.stack(phases, axis=0)                                  # (4, 4*cin, cout)
    w = jnp.pad(w, ((0, 0), (0, kin_p - kin), (0, cout_p - cout)))
    return w.astype(jnp.bfloat16)


def _pack_noise2feat_weight(w_pt, cout_p):
    """(noise_size, Cout, 4, 4) -> (16, kin_p, cout_p) bf16; phase p = kh*4 + kw."""
    cin, cout = w_pt.shape[0], w_pt.shape[1]
    kin_p = _round_up(cin, LANE)
    w = jnp.transpose(w_pt, (2, 3, 0, 1)).reshape(16, cin, cout)
    w = jnp.pad(w, ((0, 0), (0, kin_p - cin), (0, cout_p - cout)))
    return w.astype(jnp.bfloat16)


def pack_params(params):
    """PyTorch-layout params -> kernel layout (per-phase sub-kernels, lane-padded
    to 128, bf16), done once.  The ConvT bias of BN layers is dropped: a
    per-channel constant shift cancels exactly under train-mode BatchNorm."""
    def bn_layer(p, pack_w):
        cout = p["w"].shape[1]
        cout_p = _round_up(cout, LANE)
        return {"w": pack_w(p["w"], cout_p), "cout": cout,
                "gamma": p["gamma"], "beta": p["beta"]}

    packed = {
        "noise2feat": bn_layer(params["noise2feat"], _pack_noise2feat_weight),
        "up_sampling": [bn_layer(p, _pack_convt_s2_weight)
                        for p in params["up_sampling"]],
    }
    p = params["output"]
    cout = p["w"].shape[1]
    cout_p = _round_up(cout, LANE)
    packed["output"] = {
        "w": _pack_convt_s2_weight(p["w"], cout_p),
        "b": jnp.pad(p["b"], (0, cout_p - cout)).reshape(1, cout_p),
        "cout": cout,
    }
    return packed


# ---------------------------------------------------------------------------
# Forward-pass glue
# ---------------------------------------------------------------------------
def _s2_taps(x, kin_p, rows_p):
    """x: (N, H, W, C) bf16 activation -> tap slabs (4, rows_p, kin_p) bf16.
    Padded rows/lanes are exactly 0, which the consumer's BN statistics rely on."""
    n, h, w, c = x.shape
    rows = n * h * w
    xp = jnp.pad(x, ((0, 0), (1, 1), (1, 1), (0, 0)))
    phases = []
    for pi in (0, 1):
        for pj in (0, 1):
            taps = [xp[:, pi + dh:pi + dh + h, pj + dw:pj + dw + w, :]
                    for dh in (0, 1) for dw in (0, 1)]
            phases.append(jnp.concatenate(taps, axis=-1).reshape(rows, 4 * c))
    t = jnp.stack(phases, axis=0)                                  # (4, rows, 4c)
    return jnp.pad(t, ((0, 0), (0, rows_p - rows), (0, kin_p - 4 * c)))


def _bn_scale_shift(stats, cout, count, gamma, beta):
    """Fold per-tile partial sums into per-channel BN scale/shift (f32)."""
    s1 = jnp.sum(stats[:, :, 0, :cout], axis=(0, 1))
    s2 = jnp.sum(stats[:, :, 1, :cout], axis=(0, 1))
    mean = s1 / count
    var = jnp.maximum(s2 / count - mean * mean, 0.0)   # biased batch variance
    scale = gamma * jax.lax.rsqrt(var + BN_EPS)
    shift = beta - mean * scale
    return scale, shift


def _bn_relu_act(y, scale, shift, rows, cout):
    """Train-mode BN + ReLU as plain XLA elementwise ops on the raw bf16 conv
    output; XLA fuses this into the tap-slab relayout it must do anyway, so
    there is no standalone BN pass.  The row/channel slice is a no-op (elided)
    whenever rows/cout are already exact."""
    a = y[:, :rows, :cout].astype(jnp.float32)
    a = a * scale[None, None, :] + shift[None, None, :]
    return jnp.maximum(a, 0.0).astype(jnp.bfloat16)


def _run_bn_layer(taps, lay, rows, tr):
    """Conv phases + train-mode BatchNorm + ReLU.  Returns (P, rows, cout) bf16."""
    y, stats = _conv_phases_bn_stats(taps, lay["w"], tr)
    count = lay["w"].shape[0] * rows            # = N * H_out * W_out per channel
    scale, shift = _bn_scale_shift(stats, lay["cout"], count,
                                   lay["gamma"], lay["beta"])
    return _bn_relu_act(y, scale, shift, rows, lay["cout"])


def dcgan_generator_forward(noise, packed):
    """noise: (N, noise_size) f32 -> images (N, out_channels, S, S) f32 (NCHW)."""
    n, noise_size = noise.shape

    # ---- noise2feat: ConvT(k=4, s=1, p=0) on a 1x1 input == 16 matmuls sharing
    #      the same (N, noise_size) input slab.
    lay = packed["noise2feat"]
    _, kin_p, cout_p = lay["w"].shape
    rows = n
    tr = _pick_row_tile(rows, kin_p, cout_p)
    rows_p = _round_up(rows, tr)
    taps = jnp.zeros((1, rows_p, kin_p), jnp.bfloat16)
    taps = taps.at[0, :rows, :noise_size].set(noise.astype(jnp.bfloat16))
    act = _run_bn_layer(taps, lay, rows, tr)                 # (16, N, cout) bf16
    cout = lay["cout"]
    x = act.reshape(4, 4, n, cout).transpose(2, 0, 1, 3)     # NHWC (N, 4, 4, cout)

    # ---- up-sampling blocks: ConvT(k=4, s=2, p=1) + BN + ReLU
    for lay in packed["up_sampling"]:
        n_, h, w_, _ = x.shape
        rows = n_ * h * w_
        _, kin_p, cout_p = lay["w"].shape
        tr = _pick_row_tile(rows, kin_p, cout_p)
        rows_p = _round_up(rows, tr)
        taps = _s2_taps(x, kin_p, rows_p)
        act = _run_bn_layer(taps, lay, rows, tr)             # (4, rows, cout) bf16
        cout = lay["cout"]
        x = act.reshape(2, 2, n_, h, w_, cout)
        x = jnp.transpose(x, (2, 3, 0, 4, 1, 5)).reshape(n_, 2 * h, 2 * w_, cout)

    # ---- output layer: ConvT(k=4, s=2, p=1) + bias + tanh (bf16 store)
    lay = packed["output"]
    n_, h, w_, _ = x.shape
    rows = n_ * h * w_
    _, kin_p, cout_p = lay["w"].shape
    tr = _pick_row_tile(rows, kin_p, cout_p)
    rows_p = _round_up(rows, tr)
    taps = _s2_taps(x, kin_p, rows_p)
    out = _conv_phases_tanh(taps, lay["w"], lay["b"], tr)    # (4, rows_p, cout_p)
    cout = lay["cout"]
    out = out[:, :rows, :cout].reshape(2, 2, n_, h, w_, cout)
    out = jnp.transpose(out, (2, 3, 0, 4, 1, 5)).reshape(n_, 2 * h, 2 * w_, cout)
    return jnp.transpose(out, (0, 3, 1, 2)).astype(jnp.float32)   # NHWC -> NCHW


# ---------------------------------------------------------------------------
# Deterministic parameter init (synthetic; shapes match the nn.Module)
# ---------------------------------------------------------------------------
def init_params(key, noise_size, base_channels, out_channels, num_upsample):
    keys = iter(jax.random.split(key, 2 * (num_upsample + 1)))

    def conv_p(cin, cout, with_bn):
        p = {
            "w": jax.random.normal(next(keys), (cin, cout, K, K), jnp.float32) * 0.02,
            "b": jax.random.normal(next(keys), (cout,), jnp.float32) * 0.01,
        }
        if with_bn:  # PyTorch BatchNorm2d default init: weight=1, bias=0
            p["gamma"] = jnp.ones((cout,), jnp.float32)
            p["beta"] = jnp.zeros((cout,), jnp.float32)
        return p

    params = {"noise2feat": conv_p(noise_size, base_channels, True)}
    c = base_channels
    ups = []
    for _ in range(num_upsample - 1):
        ups.append(conv_p(c, c // 2, True))
        c //= 2
    params["up_sampling"] = ups
    params["output"] = conv_p(c, out_channels, False)
    return params


# ---------------------------------------------------------------------------
# Pure-JAX reference (tolerance check requested by the review)
# ---------------------------------------------------------------------------
def _ref_convt(x, w, b, stride, padding):
    """x: (N, Cin, H, W), w: (Cin, Cout, K, K) -> (N, Cout, Hout, Wout), f32."""
    n, cin, h, w_ = x.shape
    _, cout, k, _ = w.shape
    hout = (h - 1) * stride - 2 * padding + k
    wout = (w_ - 1) * stride - 2 * padding + k
    full = jnp.zeros((n, cout, (h - 1) * stride + k, (w_ - 1) * stride + k),
                     jnp.float32)
    contrib = jnp.einsum("nihw,iokl->nohwkl", x, w, precision="highest")
    for a in range(h):
        for bb in range(w_):
            full = full.at[:, :, a * stride:a * stride + k,
                           bb * stride:bb * stride + k].add(contrib[:, :, a, bb])
    out = full[:, :, padding:padding + hout, padding:padding + wout]
    return out + b[None, :, None, None]


def _ref_bn_relu(x, gamma, beta):
    mean = x.mean(axis=(0, 2, 3), keepdims=True)
    var = x.var(axis=(0, 2, 3), keepdims=True)          # biased, as in training BN
    xhat = (x - mean) * jax.lax.rsqrt(var + BN_EPS)
    return jnp.maximum(xhat * gamma[None, :, None, None]
                       + beta[None, :, None, None], 0.0)


def _ref_forward(noise, params):
    x = noise[:, :, None, None]
    p = params["noise2feat"]
    x = _ref_bn_relu(_ref_convt(x, p["w"], p["b"], 1, 0), p["gamma"], p["beta"])
    for p in params["up_sampling"]:
        x = _ref_bn_relu(_ref_convt(x, p["w"], p["b"], 2, 1), p["gamma"], p["beta"])
    p = params["output"]
    return jnp.tanh(_ref_convt(x, p["w"], p["b"], 2, 1))


if __name__ == "__main__":
    # Small config consistent with the module: output_scale=16, input_scale=4
    # => num_upsample = 2 (one up-sampling block + the output layer).
    batch, noise_size, base_channels, out_channels = 2, 16, 32, 3
    output_scale, input_scale = 16, 4
    num_upsample = int(math.log2(output_scale // input_scale))

    kp, kn = jax.random.split(jax.random.PRNGKey(0))
    params = init_params(kp, noise_size, base_channels, out_channels, num_upsample)
    packed = pack_params(params)     # one-time weight re-layout (not per-forward)
    noise = jax.random.normal(kn, (batch, noise_size), jnp.float32)

    fwd = jax.jit(lambda z: dcgan_generator_forward(z, packed))
    img = jax.block_until_ready(fwd(noise))

    assert img.shape == (batch, out_channels, output_scale, output_scale), img.shape
    assert bool(jnp.all(jnp.isfinite(img)))

    # Tolerance check vs. an f32 pure-JAX reference (kernel path runs the MXU
    # in bf16 and stores bf16 activations, so exact bit-match is not expected;
    # typical max abs error is ~1e-2 on tanh outputs in [-1, 1]).
    ref = jax.block_until_ready(jax.jit(lambda z: _ref_forward(z, params))(noise))
    err = float(jnp.max(jnp.abs(img - ref)))
    assert err < 1e-1, f"max |kernel - reference| = {err}"

    print("KERNEL_OK")
</pallas_src>

<mosaic_0001>
module attributes {stable_mosaic.version = 11 : i64} {
  func.func @_matmul_stats_kernel(%arg0: i32, %arg1: i32, %arg2: memref<1x16x128xbf16, #tpu.memory_space<vmem>>, %arg3: memref<1x128x128xbf16, #tpu.memory_space<vmem>>, %arg4: memref<1x16x128xbf16, #tpu.memory_space<vmem>>, %arg5: memref<1x1x8x128xf32, #tpu.memory_space<vmem>>) attributes {dimension_semantics = [#tpu.dimension_semantics<parallel>, #tpu.dimension_semantics<parallel>], iteration_bounds = array<i64: 16, 1>, scalar_prefetch = 0 : i64, scratch_operands = 0 : i64, tpu.core_type = #tpu.core_type<tc>, window_params = [{transform_indices = @transform_0, window_bounds = array<i64: 1, 16, 128>}, {transform_indices = @transform_1, window_bounds = array<i64: 1, 128, 128>}, {transform_indices = @transform_2, window_bounds = array<i64: 1, 16, 128>}, {transform_indices = @transform_3, window_bounds = array<i64: 1, 1, 8, 128>}]} {
    %c0 = arith.constant 0 : index
    %c0_0 = arith.constant 0 : index
    %c0_1 = arith.constant 0 : index
    %0 = vector.load %arg2[%c0, %c0_0, %c0_1] : memref<1x16x128xbf16, #tpu.memory_space<vmem>>, vector<1x16x128xbf16>
    %1 = vector.shape_cast %0 : vector<1x16x128xbf16> to vector<16x128xbf16>
    %c0_2 = arith.constant 0 : index
    %c0_3 = arith.constant 0 : index
    %c0_4 = arith.constant 0 : index
    %2 = vector.load %arg3[%c0_2, %c0_3, %c0_4] : memref<1x128x128xbf16, #tpu.memory_space<vmem>>, vector<1x128x128xbf16>
    %3 = vector.shape_cast %2 : vector<1x128x128xbf16> to vector<128x128xbf16>
    %cst = arith.constant dense<0.000000e+00> : vector<16x128xf32>
    %4 = tpu.matmul %1, %3, %cst {dimension_numbers = #tpu.dot_dimension_numbers<[1], [0], [0], [1], [0, 0, 1, 1], [], []>} : vector<16x128xbf16>, vector<128x128xbf16>, vector<16x128xf32> -> vector<16x128xf32>
    %5 = arith.truncf %4 : vector<16x128xf32> to vector<16x128xbf16>
    %c0_5 = arith.constant 0 : index
    %c0_6 = arith.constant 0 : index
    %c0_7 = arith.constant 0 : index
    %6 = vector.load %arg4[%c0_5, %c0_6, %c0_7] : memref<1x16x128xbf16, #tpu.memory_space<vmem>>, vector<1x16x128xbf16>
    %7 = vector.shape_cast %6 : vector<1x16x128xbf16> to vector<16x128xbf16>
    %8 = vector.shape_cast %5 : vector<16x128xbf16> to vector<1x16x128xbf16>
    tpu.vector_store %arg4[%c0_5, %c0_6, %c0_7], %8 {strides = array<i32>} : memref<1x16x128xbf16, #tpu.memory_space<vmem>>, vector<1x16x128xbf16>,
    %cst_8 = arith.constant dense<0.000000e+00> : vector<128xf32>
    %9 = vector.multi_reduction <add>, %4, %cst_8 [0] : vector<16x128xf32> to vector<128xf32>
    %10 = vector.shape_cast %9 : vector<128xf32> to vector<1x128xf32>
    %c0_9 = arith.constant 0 : index
    %c0_10 = arith.constant 0 : index
    %c0_11 = arith.constant 0 : index
    %c0_12 = arith.constant 0 : index
    %11 = vector.load %arg5[%c0_9, %c0_10, %c0_11, %c0_12] : memref<1x1x8x128xf32, #tpu.memory_space<vmem>>, vector<1x1x1x128xf32>
    %12 = vector.shape_cast %11 : vector<1x1x1x128xf32> to vector<1x128xf32>
    %13 = vector.shape_cast %10 : vector<1x128xf32> to vector<1x1x1x128xf32>
    tpu.vector_store %arg5[%c0_9, %c0_10, %c0_11, %c0_12], %13 {strides = array<i32>} : memref<1x1x8x128xf32, #tpu.memory_space<vmem>>, vector<1x1x1x128xf32>,
    %14 = arith.mulf %4, %4 : vector<16x128xf32>
    %cst_13 = arith.constant dense<0.000000e+00> : vector<128xf32>
    %15 = vector.multi_reduction <add>, %14, %cst_13 [0] : vector<16x128xf32> to vector<128xf32>
    %16 = vector.shape_cast %15 : vector<128xf32> to vector<1x128xf32>
    %c0_14 = arith.constant 0 : index
    %c0_15 = arith.constant 0 : index
    %c1 = arith.constant 1 : index
    %c0_16 = arith.constant 0 : index
    %17 = vector.load %arg5[%c0_14, %c0_15, %c1, %c0_16] : memref<1x1x8x128xf32, #tpu.memory_space<vmem>>, vector<1x1x1x128xf32>
    %18 = vector.shape_cast %17 : vector<1x1x1x128xf32> to vector<1x128xf32>
    %19 = vector.shape_cast %16 : vector<1x128xf32> to vector<1x1x1x128xf32>
    tpu.vector_store %arg5[%c0_14, %c0_15, %c1, %c0_16], %19 {strides = array<i32>} : memref<1x1x8x128xf32, #tpu.memory_space<vmem>>, vector<1x1x1x128xf32>,
    return
  }
  func.func @transform_0(%arg0: i32, %arg1: i32) -> (i32, i32, i32) {
    %c0_i32 = arith.constant 0 : i32
    %c0_i32_0 = arith.constant 0 : i32
    %c0_i32_1 = arith.constant 0 : i32
    return %c0_i32, %arg1, %c0_i32_0 : i32, i32, i32
  }
  func.func @transform_1(%arg0: i32, %arg1: i32) -> (i32, i32, i32) {
    %c0_i32 = arith.constant 0 : i32
    %c0_i32_0 = arith.constant 0 : i32
    %c0_i32_1 = arith.constant 0 : i32
    return %arg0, %c0_i32, %c0_i32_0 : i32, i32, i32
  }
  func.func @transform_2(%arg0: i32, %arg1: i32) -> (i32, i32, i32) {
    %c0_i32 = arith.constant 0 : i32
    %c0_i32_0 = arith.constant 0 : i32
    return %arg0, %arg1, %c0_i32 : i32, i32, i32
  }
  func.func @transform_3(%arg0: i32, %arg1: i32) -> (i32, i32, i32, i32) {
    %c0_i32 = arith.constant 0 : i32
    %c0_i32_0 = arith.constant 0 : i32
    %c0_i32_1 = arith.constant 0 : i32
    return %arg0, %arg1, %c0_i32, %c0_i32_0 : i32, i32, i32, i32
  }
}

module attributes {stable_mosaic.version = 11 : i64} {
  func.func @_matmul_stats_kernel(%arg0: i32, %arg1: i32, %arg2: memref<1x32x128xbf16, #tpu.memory_space<vmem>>, %arg3: memref<1x128x128xbf16, #tpu.memory_space<vmem>>, %arg4: memref<1x32x128xbf16, #tpu.memory_space<vmem>>, %arg5: memref<1x1x8x128xf32, #tpu.memory_space<vmem>>) attributes {dimension_semantics = [#tpu.dimension_semantics<parallel>, #tpu.dimension_semantics<parallel>], iteration_bounds = array<i64: 4, 1>, scalar_prefetch = 0 : i64, scratch_operands = 0 : i64, tpu.core_type = #tpu.core_type<tc>, window_params = [{transform_indices = @transform_0, window_bounds = array<i64: 1, 32, 128>}, {transform_indices = @transform_1, window_bounds = array<i64: 1, 128, 128>}, {transform_indices = @transform_2, window_bounds = array<i64: 1, 32, 128>}, {transform_indices = @transform_3, window_bounds = array<i64: 1, 1, 8, 128>}]} {
    %c0 = arith.constant 0 : index
    %c0_0 = arith.constant 0 : index
    %c0_1 = arith.constant 0 : index
    %0 = vector.load %arg2[%c0, %c0_0, %c0_1] : memref<1x32x128xbf16, #tpu.memory_space<vmem>>, vector<1x32x128xbf16>
    %1 = vector.shape_cast %0 : vector<1x32x128xbf16> to vector<32x128xbf16>
    %c0_2 = arith.constant 0 : index
    %c0_3 = arith.constant 0 : index
    %c0_4 = arith.constant 0 : index
    %2 = vector.load %arg3[%c0_2, %c0_3, %c0_4] : memref<1x128x128xbf16, #tpu.memory_space<vmem>>, vector<1x128x128xbf16>
    %3 = vector.shape_cast %2 : vector<1x128x128xbf16> to vector<128x128xbf16>
    %cst = arith.constant dense<0.000000e+00> : vector<32x128xf32>
    %4 = tpu.matmul %1, %3, %cst {dimension_numbers = #tpu.dot_dimension_numbers<[1], [0], [0], [1], [0, 0, 1, 1], [], []>} : vector<32x128xbf16>, vector<128x128xbf16>, vector<32x128xf32> -> vector<32x128xf32>
    %5 = arith.truncf %4 : vector<32x128xf32> to vector<32x128xbf16>
    %c0_5 = arith.constant 0 : index
    %c0_6 = arith.constant 0 : index
    %c0_7 = arith.constant 0 : index
    %6 = vector.load %arg4[%c0_5, %c0_6, %c0_7] : memref<1x32x128xbf16, #tpu.memory_space<vmem>>, vector<1x32x128xbf16>
    %7 = vector.shape_cast %6 : vector<1x32x128xbf16> to vector<32x128xbf16>
    %8 = vector.shape_cast %5 : vector<32x128xbf16> to vector<1x32x128xbf16>
    tpu.vector_store %arg4[%c0_5, %c0_6, %c0_7], %8 {strides = array<i32>} : memref<1x32x128xbf16, #tpu.memory_space<vmem>>, vector<1x32x128xbf16>,
    %cst_8 = arith.constant dense<0.000000e+00> : vector<128xf32>
    %9 = vector.multi_reduction <add>, %4, %cst_8 [0] : vector<32x128xf32> to vector<128xf32>
    %10 = vector.shape_cast %9 : vector<128xf32> to vector<1x128xf32>
    %c0_9 = arith.constant 0 : index
    %c0_10 = arith.constant 0 : index
    %c0_11 = arith.constant 0 : index
    %c0_12 = arith.constant 0 : index
    %11 = vector.load %arg5[%c0_9, %c0_10, %c0_11, %c0_12] : memref<1x1x8x128xf32, #tpu.memory_space<vmem>>, vector<1x1x1x128xf32>
    %12 = vector.shape_cast %11 : vector<1x1x1x128xf32> to vector<1x128xf32>
    %13 = vector.shape_cast %10 : vector<1x128xf32> to vector<1x1x1x128xf32>
    tpu.vector_store %arg5[%c0_9, %c0_10, %c0_11, %c0_12], %13 {strides = array<i32>} : memref<1x1x8x128xf32, #tpu.memory_space<vmem>>, vector<1x1x1x128xf32>,
    %14 = arith.mulf %4, %4 : vector<32x128xf32>
    %cst_13 = arith.constant dense<0.000000e+00> : vector<128xf32>
    %15 = vector.multi_reduction <add>, %14, %cst_13 [0] : vector<32x128xf32> to vector<128xf32>
    %16 = vector.shape_cast %15 : vector<128xf32> to vector<1x128xf32>
    %c0_14 = arith.constant 0 : index
    %c0_15 = arith.constant 0 : index
    %c1 = arith.constant 1 : index
    %c0_16 = arith.constant 0 : index
    %17 = vector.load %arg5[%c0_14, %c0_15, %c1, %c0_16] : memref<1x1x8x128xf32, #tpu.memory_space<vmem>>, vector<1x1x1x128xf32>
    %18 = vector.shape_cast %17 : vector<1x1x1x128xf32> to vector<1x128xf32>
    %19 = vector.shape_cast %16 : vector<1x128xf32> to vector<1x1x1x128xf32>
    tpu.vector_store %arg5[%c0_14, %c0_15, %c1, %c0_16], %19 {strides = array<i32>} : memref<1x1x8x128xf32, #tpu.memory_space<vmem>>, vector<1x1x1x128xf32>,
    return
  }
  func.func @transform_0(%arg0: i32, %arg1: i32) -> (i32, i32, i32) {
    %c0_i32 = arith.constant 0 : i32
    %c0_i32_0 = arith.constant 0 : i32
    return %arg0, %arg1, %c0_i32 : i32, i32, i32
  }
  func.func @transform_1(%arg0: i32, %arg1: i32) -> (i32, i32, i32) {
    %c0_i32 = arith.constant 0 : i32
    %c0_i32_0 = arith.constant 0 : i32
    %c0_i32_1 = arith.constant 0 : i32
    return %arg0, %c0_i32, %c0_i32_0 : i32, i32, i32
  }
  func.func @transform_2(%arg0: i32, %arg1: i32) -> (i32, i32, i32) {
    %c0_i32 = arith.constant 0 : i32
    %c0_i32_0 = arith.constant 0 : i32
    return %arg0, %arg1, %c0_i32 : i32, i32, i32
  }
  func.func @transform_3(%arg0: i32, %arg1: i32) -> (i32, i32, i32, i32) {
    %c0_i32 = arith.constant 0 : i32
    %c0_i32_0 = arith.constant 0 : i32
    %c0_i32_1 = arith.constant 0 : i32
    return %arg0, %arg1, %c0_i32, %c0_i32_0 : i32, i32, i32, i32
  }
}

module attributes {stable_mosaic.version = 11 : i64} {
  func.func @_matmul_bias_tanh_kernel(%arg0: i32, %arg1: i32, %arg2: memref<1x128x128xbf16, #tpu.memory_space<vmem>>, %arg3: memref<1x128x128xbf16, #tpu.memory_space<vmem>>, %arg4: memref<1x128xf32, #tpu.memory_space<vmem>>, %arg5: memref<1x128x128xbf16, #tpu.memory_space<vmem>>) attributes {dimension_semantics = [#tpu.dimension_semantics<parallel>, #tpu.dimension_semantics<parallel>], iteration_bounds = array<i64: 4, 1>, scalar_prefetch = 0 : i64, scratch_operands = 0 : i64, tpu.core_type = #tpu.core_type<tc>, window_params = [{transform_indices = @transform_0, window_bounds = array<i64: 1, 128, 128>}, {transform_indices = @transform_1, window_bounds = array<i64: 1, 128, 128>}, {pipeline_mode = #tpu.pipeline_mode<synchronous>, transform_indices = @transform_2, window_bounds = array<i64: 1, 128>}, {transform_indices = @transform_3, window_bounds = array<i64: 1, 128, 128>}]} {
    %c0 = arith.constant 0 : index
    %c0_0 = arith.constant 0 : index
    %c0_1 = arith.constant 0 : index
    %0 = vector.load %arg2[%c0, %c0_0, %c0_1] : memref<1x128x128xbf16, #tpu.memory_space<vmem>>, vector<1x128x128xbf16>
    %1 = vector.shape_cast %0 : vector<1x128x128xbf16> to vector<128x128xbf16>
    %c0_2 = arith.constant 0 : index
    %c0_3 = arith.constant 0 : index
    %c0_4 = arith.constant 0 : index
    %2 = vector.load %arg3[%c0_2, %c0_3, %c0_4] : memref<1x128x128xbf16, #tpu.memory_space<vmem>>, vector<1x128x128xbf16>
    %3 = vector.shape_cast %2 : vector<1x128x128xbf16> to vector<128x128xbf16>
    %cst = arith.constant dense<0.000000e+00> : vector<128x128xf32>
    %4 = tpu.matmul %1, %3, %cst {dimension_numbers = #tpu.dot_dimension_numbers<[1], [0], [0], [1], [0, 0, 1, 1], [], []>} : vector<128x128xbf16>, vector<128x128xbf16>, vector<128x128xf32> -> vector<128x128xf32>
    %c0_5 = arith.constant 0 : index
    %c0_6 = arith.constant 0 : index
    %5 = vector.load %arg4[%c0_5, %c0_6] : memref<1x128xf32, #tpu.memory_space<vmem>>, vector<1x128xf32>
    %6 = vector.broadcast %5 : vector<1x128xf32> to vector<128x128xf32>
    %7 = arith.addf %4, %6 : vector<128x128xf32>
    %8 = math.tanh %7 : vector<128x128xf32>
    %9 = arith.truncf %8 : vector<128x128xf32> to vector<128x128xbf16>
    %c0_7 = arith.constant 0 : index
    %c0_8 = arith.constant 0 : index
    %c0_9 = arith.constant 0 : index
    %10 = vector.load %arg5[%c0_7, %c0_8, %c0_9] : memref<1x128x128xbf16, #tpu.memory_space<vmem>>, vector<1x128x128xbf16>
    %11 = vector.shape_cast %10 : vector<1x128x128xbf16> to vector<128x128xbf16>
    %12 = vector.shape_cast %9 : vector<128x128xbf16> to vector<1x128x128xbf16>
    tpu.vector_store %arg5[%c0_7, %c0_8, %c0_9], %12 {strides = array<i32>} : memref<1x128x128xbf16, #tpu.memory_space<vmem>>, vector<1x128x128xbf16>,
    return
  }
  func.func @transform_0(%arg0: i32, %arg1: i32) -> (i32, i32, i32) {
    %c0_i32 = arith.constant 0 : i32
    %c0_i32_0 = arith.constant 0 : i32
    return %arg0, %arg1, %c0_i32 : i32, i32, i32
  }
  func.func @transform_1(%arg0: i32, %arg1: i32) -> (i32, i32, i32) {
    %c0_i32 = arith.constant 0 : i32
    %c0_i32_0 = arith.constant 0 : i32
    %c0_i32_1 = arith.constant 0 : i32
    return %arg0, %c0_i32, %c0_i32_0 : i32, i32, i32
  }
  func.func @transform_2(%arg0: i32, %arg1: i32) -> (i32, i32) {
    %c0_i32 = arith.constant 0 : i32
    %c0_i32_0 = arith.constant 0 : i32
    %c0_i32_1 = arith.constant 0 : i32
    return %c0_i32, %c0_i32_0 : i32, i32
  }
  func.func @transform_3(%arg0: i32, %arg1: i32) -> (i32, i32, i32) {
    %c0_i32 = arith.constant 0 : i32
    %c0_i32_0 = arith.constant 0 : i32
    return %arg0, %arg1, %c0_i32 : i32, i32, i32
  }
}

</mosaic_0001>

<bundles_post_ra>
// kernel: _lambda_.3
= control target key start
LH: loop header
LB: loop body
LE: loop exit
PB: predicated region body
PF: predicated region fallthrough
CT: control target
= control target key end

     0   :  { %9 = vsyncpa [#allocation3], 0  ;;  %s914_s0 = inlined_call_operand.vmem [shape: bf16[1,16,128], index: 0, kind: input, shape index: {}]   ;;  %s915_s1 = inlined_call_operand.hbm [shape: bf16[16,128,128], index: 1, kind: input, shape index: {}]   ;;  %s916_s2 = inlined_call_operand.vmem [shape: bf16[16,16,128], index: 2, kind: output, shape index: {0}]   ;;  %s917_s3 = inlined_call_operand.vmem [shape: f32[16,1,8,128], index: 3, kind: output, shape index: {1}]  }
   0x1   :  { %11 = vsyncpa [#allocation3 + $0x1], 0  ;;  %s784_s12 = smov 0   ;;  %s786_s13 = smov 0  }
   0x2   :  { %s788_s14 = smov 0   ;;  %s790_s15 = smov 0  }
   0x3   :  { %s792_s16 = smov 0   ;;  %s794_s17 = smov 0  }
   0x4 LB: > { %s545_s18 = sadd.s32 4294967295, %s757_s17   ;;  %s29_s19 = sadd.s32 1, %s753_s16  ;;  %s757_s17 = sphi %s794_s17, %s17_s17   ;;  %s753_s16 = sphi %s792_s16, %s925_s16   ;;  %s749_s15 = sphi %s790_s15, %s924_s15   ;;  %s745_s14 = sphi %s788_s14, %s923_s14   ;;  %s741_s13 = sphi %s786_s13, %s922_s13   ;;  %s737_s12 = sphi %s784_s12, %s921_s12  }
   0x5   : > { %p31_p0 = scmp.ge.s32.totalorder %s29_s19, 16  ;;  %s62_s20 = sadd.s32 1, %s745_s14 }
   0x6   : > { %p69_p1 = scmp.ne.s32.totalorder %s745_s14, %s741_s13  ;;  %p70_p2 = scmp.eq.s32.totalorder %s757_s17, 0 }
   0x7   : > { %s927_s19 = smov (%p31_p0, %s29_s19), 0  ;;  %p75_p4 = scmp.ne.s32.totalorder %s741_s13, %s737_s12 }
   0x8   : > { %p820_p3 = por %p70_p2, %p69_p1  ;;  %s59_s22 = ssub.s32 %s753_s16, %s927_s19 }
   0x9   : > { %p76_p5 = scmp.eq.s32.totalorder %s545_s18, 0  ;;  %p60_p6 = scmp.eq.s32.totalorder %s59_s22, 0 }
   0xa   : > { %p615_p8 = scmp.lt.s32.totalorder %s757_s17, 16  ;;  %s164_s25 = sand.u32 1, %s745_s14  }
   0xb   : > { %p827_p7 = por %p76_p5, %p75_p4  ;;  %s571_s26 = sshll.u32 %s753_s16, 10 }
   0xc   : > { %s833_s24 = scalar_select %p60_p6, %s745_s14, %s62_s20  }
   0xd   : > { %s550_s27 = sshll.u32 %s164_s25, 6  ;;  %s840_s30 = scalar_lea.hbm %s915_s1, %s571_s26 }
   0xe   : > { %s168_s4 = scalar_lea.vmem [#allocation2], %s550_s27  ;;  %p844_p9 = pnand %p615_p8, %p820_p3 }
   0xf   : > { %s175_s5 = sshll.u32 %s168_s4, 4  ;;  %s850_s7 = scalar_lea.sflag [#allocation3], %s164_s25  ;;  %s848_s5 = int_to_ptr.vmem [resolvable:$true] %s175_s5 }
  0x10   : > { %s677_s8 = scalar_lea.hbm %s840_s30, 1024  ;;  %p679_p11 = pneg %p844_p9 }
  0x11   : > { %p678_p10 = scmp.ne.s32.totalorder %s840_s30, %s677_s8  ;;  %s682_s11 = scalar_lea.hbm %s915_s1, 16384 }
  0x12   : > { %p683_p0 = scmp.lt.u32.totalorder %s840_s30, %s915_s1  ;;  %p684_p1 = scmp.lt.u32.totalorder %s682_s11, %s677_s8 }
  0x13   : > { %p680_p12 = pnand %p679_p11, %p678_p10  ;;  %p686_p3 = scmp.lt.u32.totalorder %s677_s8, %s840_s30 }
  0x14   : > { %p685_p2 = por %p684_p1, %p683_p0 }
  0x15   : > { %p681_p13 = pneg %p680_p12 }
  0x16   : > { %p687_p4 = por %p686_p3, %p685_p2 }
  0x18   : > { %p688_p5 = pnand %p687_p4, %p681_p13 }
  0x1a   : > { %691 = shalt.err (!%p688_p5)
}
  0x1b   : > { %s692_s20 = scalar_lea.vmem %s848_s5, 1024  ;;  %s759_s21 = smov [#allocation2]  }
  0x1c   : > { %p693_p6 = scmp.ne.s32.totalorder %s848_s5, %s692_s20  ;;  %s697_s22 = sshll.u32 %s759_s21, 4  ;;  %s698_s22 = int_to_ptr.vmem [resolvable:$false] %s697_s22 }
  0x1d   : > { %s699_s25 = scalar_lea.vmem %s698_s22, 2048  ;;  %p700_p12 = scmp.lt.s32.totalorder %s848_s5, %s698_s22 }
  0x1e   : > { %p695_p8 = pnand %p693_p6, %p679_p11  ;;  %p701_p0 = scmp.lt.s32.totalorder %s699_s25, %s692_s20 }
  0x20   : > { %p696_p10 = pneg %p695_p8  ;;  %p702_p1 = por %p701_p0, %p700_p12 }
  0x22   : > { %p703_p2 = pnand %p702_p1, %p696_p10 }
  0x24   : > { %706 = shalt.err (!%p703_p2)
}
  0x25   : > { %s760_s26 = smov 64   ;;  %s761_s27 = smov 4  }
  0x26   : > { %614 = dma.hbm_to_vmem [thread:$0]  (!%p844_p9), %s840_s30, 1024, %s848_s5, %s850_s7, %s760_s26, %s760_s26, %s761_s27  }
  0x27   : > { %p553_p11 = scmp.ge.s32.totalorder %s757_s17, 1  ;;  %p183_p13 = scmp.lt.s32.totalorder %s757_s17, 17 }
  0x29   : > { %p184_p3 = pnand %p553_p11, %p183_p13 }
  0x2a   : > { %s189_s28 = sand.u32 (!%p184_p3), 1, %s741_s13  }
  0x2b   : > { %187 = sbr.rel (%p184_p3) target bundleno = 315 (0x13b), region = 28  ;;  %s554_s29 = sshll.u32 (!%p184_p3), %s189_s28, 6 }
  0x2c   : > { %s190_s4 = scalar_lea.sflag (!%p184_p3), [#allocation3], %s189_s28  ;;  %s193_s8 = scalar_lea.vmem (!%p184_p3), [#allocation2], %s554_s29 }
  0x32   : > { %732 = dma.done.wait (%p827_p7), %s190_s4, 1024  }
  0x33   : > { %734 = vsyncadd (%p827_p7), %s190_s4, 4294966272  ;;  %v762_v0 = vmov 0.0   ;;  %vm763_vm0 = vmmov 0   ;;  %v668_v1 = vld [vmem:[%s193_s8] sm:$0xff]   ;;  %v669_v2 = vld [vmem:[%s193_s8 + $0x8] sm:$0xff]   ;;  %p239_p7 = scmp.lt.s32.totalorder %s749_s15, 15 }
  0x34   : > { %589 = vmatprep.subr.bf16.mxu0 %v762_v0  ;;  %605 = vmatprep.mubr.msk.bf16.mxu0 %vm763_vm0, %v762_v0  ;;  %v670_v3 = vld [vmem:[%s193_s8 + $0x10] sm:$0xff]   ;;  %v671_v4 = vld [vmem:[%s193_s8 + $0x18] sm:$0xff]   ;;  %v672_v5 = vld [vmem:[%s193_s8 + $0x20] sm:$0xff]  }
  0x35   : > { %590 = vmatpush3.bf16.msra.mxu0 %v668_v1  ;;  %v673_v6 = vld [vmem:[%s193_s8 + $0x28] sm:$0xff]   ;;  %v674_v7 = vld [vmem:[%s193_s8 + $0x30] sm:$0xff]   ;;  %v675_v8 = vld [vmem:[%s193_s8 + $0x38] sm:$0xff]   ;;  %s929_s15 = smov (!%p239_p7, %s749_s15), 15 }
  0x36   : > { %591 = vmatprep.subr.bf16.mxu0 %v762_v0  ;;  %v676_v9 = vld [vmem:[%s914_s0] sm:$0xff]   ;;  %s572_s5 = sshll.u32 %s929_s15, 3 }
  0x37   : > { %s246_s9 = scalar_lea.vmem %s916_s2, %s572_s5  ;;  %s254_s11 = scalar_lea.vmem %s917_s3, %s572_s5 }
  0x39   : > { %592 = vmatpush3.bf16.msra.mxu0 %v669_v2 }
  0x3a   : > { %593 = vmatprep.subr.bf16.mxu0 %v762_v0 }
  0x3d   : > { %594 = vmatpush3.bf16.msra.mxu0 %v670_v3 }
  0x3e   : > { %595 = vmatprep.subr.bf16.mxu0 %v762_v0 }
  0x41   : > { %596 = vmatpush3.bf16.msra.mxu0 %v671_v4 }
  0x42   : > { %597 = vmatprep.subr.bf16.mxu0 %v762_v0 }
  0x45   : > { %598 = vmatpush3.bf16.msra.mxu0 %v672_v5 }
  0x46   : > { %599 = vmatprep.subr.bf16.mxu0 %v762_v0 }
  0x49   : > { %600 = vmatpush3.bf16.msra.mxu0 %v673_v6 }
  0x4a   : > { %601 = vmatprep.subr.bf16.mxu0 %v762_v0 }
  0x4d   : > { %602 = vmatpush3.bf16.msra.mxu0 %v674_v7 }
  0x4e   : > { %603 = vmatprep.subr.bf16.mxu0 %v762_v0 }
  0x51   : > { %604 = vmatpush3.bf16.msra.mxu0 %v675_v8 }
  0x54   : > { %606 = vmatmul.mubr.bf16.vlgmr.msra.gmra.mrb[0].mxu0 %v676_v9 }
 0x127   : > { %v362_v10 = vpop.f32.mrb[0].mxu0 }
 0x128   : > { %v607_v11 = vpop.f32.mrb[1].mxu0  ;;  %v387_v13 = vmul.f32 %v362_v10, %v362_v10 }
 0x129   : > { %v365_v12 = vpop.f32.mrb[2].mxu0 }
 0x12a   : > { %v578_v14 = vpack.c.bf16 %v365_v12, %v362_v10  ;;  %v379_v15 = vadd.f32 %v365_v12, %v362_v10  ;;  %v388_v16 = vmul.f32 %v365_v12, %v365_v12  ;;  %v608_v17 = vpop.f32.mrb[3].mxu0 }
 0x12c   : > { %579 = vst [vmem:[%s246_s9] sm:$0xff] %v578_v14   ;;  %v380_v18 = vrot.slane %v379_v15, 4  ;;  %v389_v19 = vadd.f32 %v388_v16, %v387_v13 }
 0x12e   : > { %v381_v20 = vadd.f32 %v380_v18, %v379_v15  ;;  %v390_v21 = vrot.slane %v389_v19, 4 }
 0x130   : > { %v382_v22 = vrot.slane %v381_v20, 2  ;;  %v391_v23 = vadd.f32 %v390_v21, %v389_v19 }
 0x132   : > { %v383_v24 = vadd.f32 %v382_v22, %v381_v20  ;;  %v392_v25 = vrot.slane %v391_v23, 2 }
 0x134   : > { %v384_v26 = vrot.slane %v383_v24, 1  ;;  %v393_v27 = vadd.f32 %v392_v25, %v391_v23 }
 0x136   : > { %v385_v28 = vadd.f32 %v384_v26, %v383_v24  ;;  %v394_v29 = vrot.slane %v393_v27, 1 }
 0x138   : > { %386 = vst [vmem:[%s254_s11] sm:$0x1] %v385_v28  ;;  %v395_v30 = vadd.f32 %v394_v29, %v393_v27 }
 0x13a   : > { %396 = vst [vmem:[%s254_s11 + $0x1] sm:$0x1] %v395_v30 }
 0x13b PF: > { %s17_s17 = sadd.s32 1, %s757_s17   ;;  %s921_s12 = smov %s741_s13 }
 0x13c   : > { %p14_p9 = scmp.ge.s32.totalorder %s17_s17, 18   ;;  %s922_s13 = smov %s745_s14 }
 0x13d   : > { %s923_s14 = smov %s833_s24  ;;  %s924_s15 = smov %s753_s16 }
 0x13e   : > { %s925_s16 = smov %s927_s19  ;;  %16 = sbr.rel (!%p14_p9) target bundleno = 4 (0x4), region = 83 }
 0x145   :  { %447 = vsyncpa [#allocation3], 1 }
 0x146   :  { %449 = vsyncpa [#allocation3 + $0x1], 1 }

// kernel: _lambda_.4
= control target key start
LH: loop header
LB: loop body
LE: loop exit
PB: predicated region body
PF: predicated region fallthrough
CT: control target
= control target key end

     0   :  { %s717_s12 = smov 0   ;;  %s719_s13 = smov 0   ;;  %s765_s0 = inlined_call_operand.vmem [shape: bf16[4,32,128], index: 0, kind: input, shape index: {}]   ;;  %s766_s1 = inlined_call_operand.vmem [shape: bf16[4,128,128], index: 1, kind: input, shape index: {}]   ;;  %s767_s2 = inlined_call_operand.vmem [shape: bf16[4,32,128], index: 2, kind: output, shape index: {0}]   ;;  %s768_s3 = inlined_call_operand.vmem [shape: f32[4,1,8,128], index: 3, kind: output, shape index: {1}]  }
   0x1   :  { %s721_s14 = smov 0  }
   0x2 LB: > { %s26_s15 = sadd.s32 1, %s691_s13  ;;  %p567_p0 = scmp.ge.s32.totalorder %s695_s14, 1  ;;  %s695_s14 = sphi %s721_s14, %s14_s14   ;;  %s691_s13 = sphi %s719_s13, %s770_s13   ;;  %s687_s12 = sphi %s717_s12, %s769_s12  }
   0x3   : > { %p28_p1 = scmp.ge.s32.totalorder %s26_s15, 4  ;;  %p173_p2 = scmp.lt.s32.totalorder %s695_s14, 5 }
   0x5   : > { %s772_s15 = smov (%p28_p1, %s26_s15), 0  ;;  %p174_p3 = pnand %p567_p0, %p173_p2 }
   0x6   : > { %p218_p4 = scmp.lt.s32.totalorder (!%p174_p3), %s687_s12, 3 }
   0x7   : > { %177 = sbr.rel (%p174_p3) target bundleno = 286 (0x11e), region = 28 }
   0xe   : > { %s774_s12 = smov (!%p218_p4, %s687_s12), 3 }
   0xf   : > { %s592_s16 = sshll.u32 %s774_s12, 6  ;;  %s591_s20 = sshll.u32 %s774_s12, 4 }
  0x10   : > { %s231_s19 = scalar_lea.vmem %s766_s1, %s592_s16  ;;  %s225_s23 = scalar_lea.vmem %s765_s0, %s591_s20 }
  0x11   : > { %v663_v0 = vld [vmem:[%s231_s19] sm:$0xff]   ;;  %v664_v1 = vld [vmem:[%s231_s19 + $0x8] sm:$0xff]   ;;  %v665_v2 = vld [vmem:[%s231_s19 + $0x10] sm:$0xff]   ;;  %s240_s26 = scalar_lea.vmem %s767_s2, %s591_s20  ;;  %s574_s27 = sshll.u32 %s774_s12, 3 }
  0x12   : > { %619 = vmatprep.subr.bf16.mxu0 %v663_v0  ;;  %v666_v3 = vld [vmem:[%s231_s19 + $0x18] sm:$0xff]   ;;  %v671_v4 = vld [vmem:[%s225_s23] sm:$0xff]   ;;  %v668_v6 = vld [vmem:[%s231_s19 + $0x28] sm:$0xff]   ;;  %s248_s30 = scalar_lea.vmem %s768_s3, %s574_s27 }
  0x13   : > { %620 = vmatpush3.bf16.msra.mxu0 %v663_v0  ;;  %635 = vmatprep.mubr.bf16.mxu0 %v671_v4  ;;  %v667_v5 = vld [vmem:[%s231_s19 + $0x20] sm:$0xff]   ;;  %v669_v7 = vld [vmem:[%s231_s19 + $0x30] sm:$0xff]   ;;  %v670_v8 = vld [vmem:[%s231_s19 + $0x38] sm:$0xff]  }
  0x14   : > { %621 = vmatprep.subr.bf16.mxu0 %v664_v1  ;;  %v672_v9 = vld [vmem:[%s225_s23 + $0x8] sm:$0xff]  }
  0x17   : > { %622 = vmatpush3.bf16.msra.mxu0 %v664_v1 }
  0x18   : > { %623 = vmatprep.subr.bf16.mxu0 %v665_v2 }
  0x1b   : > { %624 = vmatpush3.bf16.msra.mxu0 %v665_v2 }
  0x1c   : > { %625 = vmatprep.subr.bf16.mxu0 %v666_v3 }
  0x1f   : > { %626 = vmatpush3.bf16.msra.mxu0 %v666_v3 }
  0x20   : > { %627 = vmatprep.subr.bf16.mxu0 %v667_v5 }
  0x23   : > { %628 = vmatpush3.bf16.msra.mxu0 %v667_v5 }
  0x24   : > { %629 = vmatprep.subr.bf16.mxu0 %v668_v6 }
  0x27   : > { %630 = vmatpush3.bf16.msra.mxu0 %v668_v6 }
  0x28   : > { %631 = vmatprep.subr.bf16.mxu0 %v669_v7 }
  0x2b   : > { %632 = vmatpush3.bf16.msra.mxu0 %v669_v7 }
  0x2c   : > { %633 = vmatprep.subr.bf16.mxu0 %v670_v8 }
  0x2f   : > { %634 = vmatpush3.bf16.msra.mxu0 %v670_v8 }
  0x32   : > { %636 = vmatmul.mubr.bf16.vlgmr.msra.gmra.mrb[0].mxu0 %v672_v9 }
 0x105   : > { %v637_v10 = vpop.f32.mrb[0].mxu0 }
 0x106   : > { %v364_v11 = vpop.f32.mrb[1].mxu0  ;;  %v411_v19 = vmul.f32 %v637_v10, %v637_v10 }
 0x107   : > { %v638_v12 = vpop.f32.mrb[2].mxu0  ;;  %v409_v15 = vmul.f32 %v364_v11, %v364_v11 }
 0x108   : > { %v606_v13 = vpack.c.bf16 %v638_v12, %v637_v10  ;;  %v367_v14 = vpop.f32.mrb[3].mxu0  ;;  %v412_v22 = vmul.f32 %v638_v12, %v638_v12 }
 0x109   : > { %v601_v16 = vpack.c.bf16 %v367_v14, %v364_v11  ;;  %v399_v17 = vadd.f32 %v367_v14, %v364_v11  ;;  %v410_v18 = vmul.f32 %v367_v14, %v367_v14 }
 0x10a   : > { %608 = vst [vmem:[%s240_s26 + $0x8] sm:$0xff] %v606_v13  }
 0x10b   : > { %602 = vst [vmem:[%s240_s26] sm:$0xff] %v601_v16   ;;  %v400_v20 = vadd.f32 %v637_v10, %v399_v17  ;;  %v413_v21 = vadd.f32 %v410_v18, %v409_v15 }
 0x10d   : > { %v401_v23 = vadd.f32 %v638_v12, %v400_v20  ;;  %v414_v24 = vadd.f32 %v413_v21, %v411_v19 }
 0x10f   : > { %v402_v25 = vrot.slane %v401_v23, 4  ;;  %v415_v26 = vadd.f32 %v414_v24, %v412_v22 }
 0x111   : > { %v403_v27 = vadd.f32 %v402_v25, %v401_v23  ;;  %v416_v28 = vrot.slane %v415_v26, 4 }
 0x113   : > { %v404_v29 = vrot.slane %v403_v27, 2  ;;  %v417_v30 = vadd.f32 %v416_v28, %v415_v26 }
 0x115   : > { %v405_v31 = vadd.f32 %v404_v29, %v403_v27  ;;  %v418_v32 = vrot.slane %v417_v30, 2 }
 0x117   : > { %v406_v33 = vrot.slane %v405_v31, 1  ;;  %v419_v34 = vadd.f32 %v418_v32, %v417_v30 }
 0x119   : > { %v407_v35 = vadd.f32 %v406_v33, %v405_v31  ;;  %v420_v36 = vrot.slane %v419_v34, 1 }
 0x11b   : > { %408 = vst [vmem:[%s248_s30] sm:$0x1] %v407_v35  ;;  %v421_v37 = vadd.f32 %v420_v36, %v419_v34 }
 0x11d   : > { %422 = vst [vmem:[%s248_s30 + $0x1] sm:$0x1] %v421_v37 }
 0x11e PF: > { %s14_s14 = sadd.s32 1, %s695_s14   ;;  %s769_s12 = smov %s691_s13 }
 0x11f   : > { %p11_p5 = scmp.ge.s32.totalorder %s14_s14, 6   ;;  %s770_s13 = smov %s772_s15 }
 0x121   :  { %13 = sbr.rel (!%p11_p5) target bundleno = 2 (0x2), region = 73 }

// kernel: _lambda_.5
= control target key start
LH: loop header
LB: loop body
LE: loop exit
PB: predicated region body
PF: predicated region fallthrough
CT: control target
= control target key end

     0   :  { %s950_s12 = smov 0   ;;  %s952_s13 = smov 0   ;;  %s1014_s0 = inlined_call_operand.vmem [shape: bf16[4,128,128], index: 0, kind: input, shape index: {}]   ;;  %s1015_s1 = inlined_call_operand.vmem [shape: bf16[4,128,128], index: 1, kind: input, shape index: {}]   ;;  %s1016_s2 = inlined_call_operand.vmem [shape: f32[1,128], index: 2, kind: input, shape index: {}]   ;;  %s1017_s3 = inlined_call_operand.vmem [shape: bf16[4,128,128], index: 3, kind: output, shape index: {}]  }
   0x1   :  { %s954_s14 = smov 0  }
   0x2 LB: > { %s25_s15 = sadd.s32 1, %s924_s13  ;;  %p662_p0 = scmp.ge.s32.totalorder %s928_s14, 1  ;;  %s928_s14 = sphi %s954_s14, %s13_s14   ;;  %s924_s13 = sphi %s952_s13, %s1019_s13   ;;  %s920_s12 = sphi %s950_s12, %s1018_s12  }
   0x3   : > { %p27_p1 = scmp.ge.s32.totalorder %s25_s15, 4  ;;  %p168_p2 = scmp.lt.s32.totalorder %s928_s14, 5 }
   0x5   : > { %s1021_s15 = smov (%p27_p1, %s25_s15), 0  ;;  %p169_p3 = pnand %p662_p0, %p168_p2 }
   0x6   : > { %p206_p4 = scmp.lt.s32.totalorder (!%p169_p3), %s920_s12, 3  ;;  %v669_v16 = vld [vmem:[%s1016_s2] ss:$0 sm:$0xff] (!%p169_p3) }
   0x7   : > { %172 = sbr.rel (%p169_p3) target bundleno = 293 (0x125), region = 32 }
   0xe   : > { %s1023_s12 = smov (!%p206_p4, %s920_s12), 3 }
   0xf   : > { %s968_s16 = sshll.u32 %s1023_s12, 6 }
  0x10   : > { %s974_s19 = scalar_lea.vmem %s1015_s1, %s968_s16  ;;  %s983_s22 = scalar_lea.vmem %s1014_s0, %s968_s16 }
  0x11   : > { %v858_v0 = vld [vmem:[%s974_s19] sm:$0xff]   ;;  %v859_v1 = vld [vmem:[%s974_s19 + $0x8] sm:$0xff]   ;;  %v860_v2 = vld [vmem:[%s974_s19 + $0x10] sm:$0xff]   ;;  %s228_s27 = scalar_lea.vmem %s1017_s3, %s968_s16 }
  0x12   : > { %786 = vmatprep.subr.bf16.mxu0 %v858_v0  ;;  %818 = vmatprep.subr.bf16.mxu1 %v858_v0  ;;  %v861_v3 = vld [vmem:[%s974_s19 + $0x18] sm:$0xff]   ;;  %v866_v4 = vld [vmem:[%s983_s22] sm:$0xff]   ;;  %v863_v7 = vld [vmem:[%s974_s19 + $0x28] sm:$0xff]  }
  0x13   : > { %787 = vmatpush3.bf16.msra.mxu0 %v858_v0  ;;  %826 = vmatpush3.bf16.msra.mxu1 %v858_v0  ;;  %v867_v5 = vld [vmem:[%s983_s22 + $0x20] sm:$0xff]   ;;  %v864_v8 = vld [vmem:[%s974_s19 + $0x30] sm:$0xff]   ;;  %v865_v9 = vld [vmem:[%s974_s19 + $0x38] sm:$0xff]  }
  0x14   : > { %788 = vmatprep.subr.bf16.mxu0 %v859_v1  ;;  %819 = vmatprep.subr.bf16.mxu1 %v859_v1  ;;  %v862_v6 = vld [vmem:[%s974_s19 + $0x20] sm:$0xff]   ;;  %v868_v10 = vld [vmem:[%s983_s22 + $0x8] sm:$0xff]   ;;  %v870_v12 = vld [vmem:[%s983_s22 + $0x10] sm:$0xff]  }
  0x15   : > { %802 = vmatprep.mubr.bf16.mxu0 %v866_v4  ;;  %810 = vmatprep.mubr.bf16.mxu1 %v867_v5  ;;  %v869_v11 = vld [vmem:[%s983_s22 + $0x28] sm:$0xff]   ;;  %v871_v13 = vld [vmem:[%s983_s22 + $0x30] sm:$0xff]   ;;  %v872_v14 = vld [vmem:[%s983_s22 + $0x18] sm:$0xff]  }
  0x16   : > { %v873_v15 = vld [vmem:[%s983_s22 + $0x38] sm:$0xff]  }
  0x17   : > { %789 = vmatpush3.bf16.msra.mxu0 %v859_v1  ;;  %827 = vmatpush3.bf16.msra.mxu1 %v859_v1 }
  0x18   : > { %790 = vmatprep.subr.bf16.mxu0 %v860_v2  ;;  %820 = vmatprep.subr.bf16.mxu1 %v860_v2 }
  0x1b   : > { %791 = vmatpush3.bf16.msra.mxu0 %v860_v2  ;;  %828 = vmatpush3.bf16.msra.mxu1 %v860_v2 }
  0x1c   : > { %792 = vmatprep.subr.bf16.mxu0 %v861_v3  ;;  %821 = vmatprep.subr.bf16.mxu1 %v861_v3 }
  0x1f   : > { %793 = vmatpush3.bf16.msra.mxu0 %v861_v3  ;;  %829 = vmatpush3.bf16.msra.mxu1 %v861_v3 }
  0x20   : > { %794 = vmatprep.subr.bf16.mxu0 %v862_v6  ;;  %822 = vmatprep.subr.bf16.mxu1 %v862_v6 }
  0x23   : > { %795 = vmatpush3.bf16.msra.mxu0 %v862_v6  ;;  %830 = vmatpush3.bf16.msra.mxu1 %v862_v6 }
  0x24   : > { %796 = vmatprep.subr.bf16.mxu0 %v863_v7  ;;  %823 = vmatprep.subr.bf16.mxu1 %v863_v7 }
  0x27   : > { %797 = vmatpush3.bf16.msra.mxu0 %v863_v7  ;;  %831 = vmatpush3.bf16.msra.mxu1 %v863_v7 }
  0x28   : > { %798 = vmatprep.subr.bf16.mxu0 %v864_v8  ;;  %824 = vmatprep.subr.bf16.mxu1 %v864_v8 }
  0x2b   : > { %799 = vmatpush3.bf16.msra.mxu0 %v864_v8  ;;  %832 = vmatpush3.bf16.msra.mxu1 %v864_v8 }
  0x2c   : > { %800 = vmatprep.subr.bf16.mxu0 %v865_v9  ;;  %825 = vmatprep.subr.bf16.mxu1 %v865_v9 }
  0x2f   : > { %801 = vmatpush3.bf16.msra.mxu0 %v865_v9  ;;  %833 = vmatpush3.bf16.msra.mxu1 %v865_v9 }
  0x32   : > { %803 = vmatmul.mubr.bf16.vlgmr.msra.gmra.mrb[0].mxu0 %v868_v10  ;;  %811 = vmatmul.mubr.bf16.vlgmr.msra.gmra.mrb[0].mxu1 %v869_v11 }
  0x33   : > { %806 = vmatprep.mubr.bf16.mxu0 %v870_v12  ;;  %814 = vmatprep.mubr.bf16.mxu1 %v871_v13 }
  0x3a   : > { %807 = vmatmul.mubr.bf16.gmra.mrb[4].mxu0 %v872_v14  ;;  %815 = vmatmul.mubr.bf16.gmra.mrb[4].mxu1 %v873_v15 }
 0x105   : > { %v804_v17 = vpop.f32.mrb[0].mxu0  ;;  %v812_v18 = vpop.f32.mrb[0].mxu1 }
 0x106   : > { %v409_v19 = vadd.f32 %v804_v17, %v669_v16  ;;  %v441_v20 = vadd.f32 %v812_v18, %v669_v16  ;;  %v400_v21 = vpop.f32.mrb[1].mxu0  ;;  %v432_v22 = vpop.f32.mrb[1].mxu1 }
 0x107   : > { %v401_v23 = vadd.f32 %v669_v16, %v400_v21  ;;  %v433_v24 = vadd.f32 %v669_v16, %v432_v22  ;;  %v805_v25 = vpop.f32.mrb[2].mxu0  ;;  %v813_v26 = vpop.f32.mrb[2].mxu1 }
 0x108   : > { %874 = vtanh.f32 %v409_v19  ;;  %v412_v27 = vadd.f32 %v805_v25, %v669_v16  ;;  %v403_v28 = vpop.f32.mrb[3].mxu0  ;;  %v435_v29 = vpop.f32.mrb[3].mxu1  ;;  %v444_v30 = vadd.f32 %v813_v26, %v669_v16 }
 0x109   : > { %876 = vtanh.f32 %v441_v20  ;;  %v404_v31 = vadd.f32 %v669_v16, %v403_v28  ;;  %v436_v32 = vadd.f32 %v669_v16, %v435_v29 }
 0x10a   : > { %878 = vtanh.f32 %v401_v23 }
 0x10b   : > { %880 = vtanh.f32 %v433_v24 }
 0x10c   : > { %882 = vtanh.f32 %v412_v27 }
 0x10d   : > { %884 = vtanh.f32 %v444_v30  ;;  %v808_v33 = vpop.f32.mrb[4].mxu0  ;;  %v816_v34 = vpop.f32.mrb[4].mxu1 }
 0x10e   : > { %886 = vtanh.f32 %v404_v31  ;;  %v425_v35 = vadd.f32 %v808_v33, %v669_v16  ;;  %v457_v36 = vadd.f32 %v816_v34, %v669_v16  ;;  %v416_v37 = vpop.f32.mrb[5].mxu0  ;;  %v448_v38 = vpop.f32.mrb[5].mxu1 }
 0x10f   : > { %888 = vtanh.f32 %v436_v32  ;;  %v417_v39 = vadd.f32 %v669_v16, %v416_v37  ;;  %v449_v40 = vadd.f32 %v669_v16, %v448_v38  ;;  %v809_v41 = vpop.f32.mrb[6].mxu0  ;;  %v817_v42 = vpop.f32.mrb[6].mxu1 }
 0x110   : > { %890 = vtanh.f32 %v425_v35  ;;  %v428_v43 = vadd.f32 %v809_v41, %v669_v16  ;;  %v419_v44 = vpop.f32.mrb[7].mxu0  ;;  %v451_v45 = vpop.f32.mrb[7].mxu1  ;;  %v460_v46 = vadd.f32 %v817_v42, %v669_v16 }
 0x111   : > { %892 = vtanh.f32 %v457_v36  ;;  %v420_v48 = vadd.f32 %v669_v16, %v419_v44  ;;  %v452_v50 = vadd.f32 %v669_v16, %v451_v45 }
 0x112   : > { %v875_v47 = vpop.eup %874  ;;  %894 = vtanh.f32 %v417_v39 }
 0x113   : > { %v877_v49 = vpop.eup %876  ;;  %896 = vtanh.f32 %v449_v40 }
 0x114   : > { %v879_v51 = vpop.eup %878  ;;  %898 = vtanh.f32 %v428_v43 }
 0x115   : > { %v881_v52 = vpop.eup %880  ;;  %900 = vtanh.f32 %v460_v46 }
 0x116   : > { %v883_v53 = vpop.eup %882  ;;  %902 = vtanh.f32 %v420_v48 }
 0x117   : > { %v885_v54 = vpop.eup %884  ;;  %v731_v55 = vpack.c.bf16 %v883_v53, %v875_v47  ;;  %904 = vtanh.f32 %v452_v50 }
 0x118   : > { %v887_v56 = vpop.eup %886  ;;  %v751_v57 = vpack.c.bf16 %v885_v54, %v877_v49 }
 0x119   : > { %v889_v58 = vpop.eup %888  ;;  %763 = vst [vmem:[%s228_s27 + $0x8] sm:$0xff] %v731_v55   ;;  %v726_v59 = vpack.c.bf16 %v887_v56, %v879_v51 }
 0x11a   : > { %v891_v60 = vpop.eup %890  ;;  %767 = vst [vmem:[%s228_s27 + $0x28] sm:$0xff] %v751_v57   ;;  %v746_v61 = vpack.c.bf16 %v889_v58, %v881_v52 }
 0x11b   : > { %v893_v62 = vpop.eup %892  ;;  %727 = vst [vmem:[%s228_s27] sm:$0xff] %v726_v59  }
 0x11c   : > { %v895_v63 = vpop.eup %894  ;;  %766 = vst [vmem:[%s228_s27 + $0x20] sm:$0xff] %v746_v61  }
 0x11d   : > { %v897_v0 = vpop.eup %896 }
 0x11e   : > { %v899_v1 = vpop.eup %898 }
 0x11f   : > { %v901_v2 = vpop.eup %900  ;;  %v741_v3 = vpack.c.bf16 %v899_v1, %v891_v60 }
 0x120   : > { %v903_v4 = vpop.eup %902  ;;  %v761_v5 = vpack.c.bf16 %v901_v2, %v893_v62 }
 0x121   : > { %v905_v6 = vpop.eup %904  ;;  %765 = vst [vmem:[%s228_s27 + $0x18] sm:$0xff] %v741_v3   ;;  %v736_v7 = vpack.c.bf16 %v903_v4, %v895_v63 }
 0x122   : > { %769 = vst [vmem:[%s228_s27 + $0x38] sm:$0xff] %v761_v5   ;;  %v756_v8 = vpack.c.bf16 %v905_v6, %v897_v0 }
 0x123   : > { %764 = vst [vmem:[%s228_s27 + $0x10] sm:$0xff] %v736_v7  }
 0x124   : > { %768 = vst [vmem:[%s228_s27 + $0x30] sm:$0xff] %v756_v8  }
 0x125 PF: > { %s13_s14 = sadd.s32 1, %s928_s14   ;;  %s1018_s12 = smov %s924_s13 }
 0x126   : > { %p10_p5 = scmp.ge.s32.totalorder %s13_s14, 6   ;;  %s1019_s13 = smov %s1021_s15 }
 0x128   :  { %12 = sbr.rel (!%p10_p5) target bundleno = 2 (0x2), region = 65 }

</bundles_post_ra>
